<compile_context>
chip_gen: v5e
topology: v5e:2x2
jax: 0.10.0
libtpu: 0.0.40
codegen_flags: <defaults>
</compile_context>

<pallas_src>
import functools

import jax
import jax.numpy as jnp
from jax.experimental import pallas as pl
from jax.experimental.pallas import tpu as pltpu

_REDUCTION_MODES = ("none", "mean", "sum")
_EPS = 1e-12


# ----------------------------------------------------------------------------
# Kernels
# ----------------------------------------------------------------------------
def _l1_rowsum_kernel(p_ref, t_ref, lsum_ref):
    """Per-row sum of |p - t| (unweighted fast path, 2 input streams)."""
    p = p_ref[...].astype(jnp.float32)
    t = t_ref[...].astype(jnp.float32)
    lsum_ref[...] = jnp.sum(jnp.abs(p - t), axis=-1, keepdims=True)


def _l1_rowsum_weighted_kernel(p_ref, t_ref, w_ref, lsum_ref, wsum_ref):
    """Per-row sum of |p - t| * w and per-row sum of w."""
    p = p_ref[...].astype(jnp.float32)
    t = t_ref[...].astype(jnp.float32)
    w = w_ref[...].astype(jnp.float32)
    lsum_ref[...] = jnp.sum(jnp.abs(p - t) * w, axis=-1, keepdims=True)
    wsum_ref[...] = jnp.sum(w, axis=-1, keepdims=True)


def _l1_elementwise_kernel(p_ref, t_ref, o_ref, *, loss_weight):
    """Element-wise loss_weight * |p - t| (reduction='none', no weight)."""
    d = jnp.abs(p_ref[...].astype(jnp.float32) - t_ref[...].astype(jnp.float32))
    if loss_weight != 1.0:
        d = d * loss_weight
    o_ref[...] = d.astype(o_ref.dtype)


def _l1_elementwise_weighted_kernel(p_ref, t_ref, w_ref, o_ref, *, loss_weight):
    """Element-wise loss_weight * |p - t| * w (reduction='none')."""
    d = jnp.abs(p_ref[...].astype(jnp.float32) - t_ref[...].astype(jnp.float32))
    d = d * w_ref[...].astype(jnp.float32)
    if loss_weight != 1.0:
        d = d * loss_weight
    o_ref[...] = d.astype(o_ref.dtype)


# ----------------------------------------------------------------------------
# Layout helpers
# ----------------------------------------------------------------------------
def _round_up(x, m):
    return ((x + m - 1) // m) * m


def _layout(n, chw, itemsize=4, target_block_bytes=1 << 20):
    """Pick (tile, chw_pad, rows, bn) for the lane-dense (rows, tile) view."""
    # Lane tile: multiple of 128, sized so an (8, tile) block is ~1 MiB.
    max_tile = max(128, (target_block_bytes // (8 * itemsize)) // 128 * 128)
    tile = min(_round_up(chw, 128), max_tile)
    chw_pad = _round_up(chw, tile)          # per-sample padded length
    rows = n * (chw_pad // tile)
    bn = 1
    for cand in (8, 4, 2):                  # sublane-dense row blocks
        if rows % cand == 0:
            bn = cand
            break
    return tile, chw_pad, rows, bn


def _as_rows(x2d, chw, chw_pad, rows, tile):
    """(n, chw) -> zero-padded, contiguous (rows, tile) view."""
    if chw_pad != chw:
        x2d = jnp.pad(x2d, ((0, 0), (0, chw_pad - chw)))
    return x2d.reshape(rows, tile)


# ----------------------------------------------------------------------------
# Wrapper (glue in plain JAX)
# ----------------------------------------------------------------------------
def l1_loss_pallas(pred, target, weight=None, reduction="mean",
                   sample_wise=False, loss_weight=1.0):
    """JAX/Pallas equivalent of the @masked_loss-decorated l1_loss."""
    if reduction not in _REDUCTION_MODES:
        raise ValueError(f"Unsupported reduction mode: {reduction}. "
                         f"Supported ones are: {list(_REDUCTION_MODES)}")
    n, c, h, w_dim = pred.shape
    chw = c * h * w_dim
    has_weight = weight is not None

    p2 = pred.reshape(n, chw)
    t2 = target.reshape(n, chw)
    if has_weight:
        # weight may have C == 1 (broadcast over channels), like the torch code.
        # Keep its native dtype through the DMA; cast to f32 inside the kernel.
        w2 = jnp.broadcast_to(weight, pred.shape).reshape(n, chw)

    tile, chw_pad, rows, bn = _layout(n, chw)
    grid = (rows // bn,)

    def data_spec():
        return pl.BlockSpec((bn, tile), lambda i: (i, 0))

    pr = _as_rows(p2, chw, chw_pad, rows, tile)
    tr = _as_rows(t2, chw, chw_pad, rows, tile)
    if has_weight:
        wr = _as_rows(w2, chw, chw_pad, rows, tile)

    cparams = pltpu.CompilerParams(
        dimension_semantics=("parallel",),
        vmem_limit_bytes=32 * 1024 * 1024,
    )

    if reduction == "none":
        out_dtype = (jnp.promote_types(pred.dtype, weight.dtype)
                     if has_weight else pred.dtype)
        if has_weight:
            kern = functools.partial(_l1_elementwise_weighted_kernel,
                                     loss_weight=float(loss_weight))
            operands = (pr, tr, wr)
            in_specs = [data_spec(), data_spec(), data_spec()]
        else:
            kern = functools.partial(_l1_elementwise_kernel,
                                     loss_weight=float(loss_weight))
            operands = (pr, tr)
            in_specs = [data_spec(), data_spec()]

        out = pl.pallas_call(
            kern,
            out_shape=jax.ShapeDtypeStruct((rows, tile), out_dtype),
            grid_spec=pltpu.PrefetchScalarGridSpec(
                num_scalar_prefetch=0,
                grid=grid,
                in_specs=in_specs,
                out_specs=pl.BlockSpec((bn, tile), lambda i: (i, 0)),
            ),
            compiler_params=cparams,
        )(*operands)

        out = out.reshape(n, chw_pad)
        if chw_pad != chw:
            out = out[:, :chw]
        return out.reshape(n, c, h, w_dim)

    # reduction in {'mean', 'sum'} -> per-row sums computed in the kernel,
    # tiny final reductions done in plain JAX.
    if has_weight:
        lsum, wsum = pl.pallas_call(
            _l1_rowsum_weighted_kernel,
            out_shape=(jax.ShapeDtypeStruct((rows, 1), jnp.float32),
                       jax.ShapeDtypeStruct((rows, 1), jnp.float32)),
            grid_spec=pltpu.PrefetchScalarGridSpec(
                num_scalar_prefetch=0,
                grid=grid,
                in_specs=[data_spec(), data_spec(), data_spec()],
                out_specs=[pl.BlockSpec((bn, 1), lambda i: (i, 0)),
                           pl.BlockSpec((bn, 1), lambda i: (i, 0))],
            ),
            compiler_params=cparams,
        )(pr, tr, wr)
    else:
        lsum = pl.pallas_call(
            _l1_rowsum_kernel,
            out_shape=jax.ShapeDtypeStruct((rows, 1), jnp.float32),
            grid_spec=pltpu.PrefetchScalarGridSpec(
                num_scalar_prefetch=0,
                grid=grid,
                in_specs=[data_spec(), data_spec()],
                out_specs=pl.BlockSpec((bn, 1), lambda i: (i, 0)),
            ),
            compiler_params=cparams,
        )(pr, tr)
        wsum = None

    if reduction == "sum":
        # mask_reduce_loss: weighted loss then plain sum
        loss = jnp.sum(lsum)
    else:  # 'mean'
        if not has_weight:
            loss = jnp.sum(lsum) / (n * chw)
        elif sample_wise:
            # (loss / (per-sample weight sum + eps)).sum() / N
            k = chw_pad // tile
            ls = jnp.sum(lsum.reshape(n, k), axis=1)
            ws = jnp.sum(wsum.reshape(n, k), axis=1)
            loss = jnp.sum(ls / (ws + _EPS)) / n
        else:
            # loss.sum() / (weight.sum() + eps)   (eps added exactly once)
            loss = jnp.sum(lsum) / (jnp.sum(wsum) + _EPS)
    # Accumulation is in f32; return the f32 scalar scaled by loss_weight.
    return loss_weight * loss


class L1Loss:
    """L1 (MAE) loss, Pallas-backed (mirror of the PyTorch L1Loss module)."""

    def __init__(self, loss_weight=1.0, reduction="mean", sample_wise=False):
        if reduction not in _REDUCTION_MODES:
            raise ValueError(f"Unsupported reduction mode: {reduction}. "
                             f"Supported ones are: {list(_REDUCTION_MODES)}")
        self.loss_weight = loss_weight
        self.reduction = reduction
        self.sample_wise = sample_wise

    def __call__(self, pred, target, weight=None, **kwargs):
        return l1_loss_pallas(pred, target, weight,
                              reduction=self.reduction,
                              sample_wise=self.sample_wise,
                              loss_weight=self.loss_weight)


# ----------------------------------------------------------------------------
# Demo / self-check
# ----------------------------------------------------------------------------
if __name__ == "__main__":
    key = jax.random.PRNGKey(0)
    k1, k2, k3, k4, k5, k6 = jax.random.split(key, 6)

    N, C, H, W = 2, 4, 16, 16
    pred = jax.random.normal(k1, (N, C, H, W), jnp.float32)
    target = jax.random.normal(k2, (N, C, H, W), jnp.float32)
    weight = jax.random.uniform(k3, (N, C, H, W), jnp.float32)

    # default module: reduction='mean', weight=None
    loss_mean = jax.block_until_ready(L1Loss(reduction="mean")(pred, target))
    ref_mean = jnp.mean(jnp.abs(pred - target))
    assert jnp.allclose(loss_mean, ref_mean, rtol=1e-5, atol=1e-6)

    # reduction='sum' with a non-trivial loss_weight
    loss_sum = jax.block_until_ready(
        L1Loss(loss_weight=0.5, reduction="sum")(pred, target))
    ref_sum = 0.5 * jnp.sum(jnp.abs(pred - target))
    assert jnp.allclose(loss_sum, ref_sum, rtol=1e-5, atol=1e-4)

    # reduction='none'
    loss_none = jax.block_until_ready(L1Loss(reduction="none")(pred, target))
    assert loss_none.shape == pred.shape
    assert jnp.allclose(loss_none, jnp.abs(pred - target), rtol=1e-5, atol=1e-6)

    # weighted mean, sample_wise=True
    loss_sw = jax.block_until_ready(
        L1Loss(reduction="mean", sample_wise=True)(pred, target, weight))
    el = jnp.abs(pred - target) * weight
    wsum_ref = jnp.sum(weight, axis=(1, 2, 3), keepdims=True)
    ref_sw = jnp.sum(el / (wsum_ref + 1e-12)) / N
    assert jnp.allclose(loss_sw, ref_sw, rtol=1e-5, atol=1e-6)

    # weighted mean, sample_wise=False (eps added exactly once, like torch)
    loss_w = jax.block_until_ready(
        L1Loss(reduction="mean", sample_wise=False)(pred, target, weight))
    ref_w = jnp.sum(el) / (jnp.sum(weight) + 1e-12)
    assert jnp.allclose(loss_w, ref_w, rtol=1e-5, atol=1e-6)

    # non-128-aligned CHW (padding path), odd N, and C==1 broadcast weight
    pred2 = jax.random.normal(k4, (3, 3, 5, 7), jnp.float32)
    target2 = jax.random.normal(k5, (3, 3, 5, 7), jnp.float32)
    weight2 = jax.random.uniform(k6, (3, 1, 5, 7), jnp.float32)

    loss2_mean = jax.block_until_ready(L1Loss(reduction="mean")(pred2, target2))
    assert jnp.allclose(loss2_mean, jnp.mean(jnp.abs(pred2 - target2)),
                        rtol=1e-5, atol=1e-6)

    loss2_none = jax.block_until_ready(
        L1Loss(reduction="none")(pred2, target2, weight2))
    ref2_none = jnp.abs(pred2 - target2) * jnp.broadcast_to(weight2, pred2.shape)
    assert jnp.allclose(loss2_none, ref2_none, rtol=1e-5, atol=1e-6)

    print("KERNEL_OK")
</pallas_src>

<mosaic_0001>
module attributes {stable_mosaic.version = 11 : i64} {
  func.func @_l1_rowsum_kernel(%arg0: i32, %arg1: memref<2x1024xf32, #tpu.memory_space<vmem>>, %arg2: memref<2x1024xf32, #tpu.memory_space<vmem>>, %arg3: memref<2x1xf32, #tpu.memory_space<vmem>>) attributes {dimension_semantics = [#tpu.dimension_semantics<parallel>], iteration_bounds = array<i64: 1>, scalar_prefetch = 0 : i64, scratch_operands = 0 : i64, tpu.core_type = #tpu.core_type<tc>, window_params = [{transform_indices = @transform_0, window_bounds = array<i64: 2, 1024>}, {transform_indices = @transform_1, window_bounds = array<i64: 2, 1024>}, {transform_indices = @transform_2, window_bounds = array<i64: 2, 1>}]} {
    %c0 = arith.constant 0 : index
    %c0_0 = arith.constant 0 : index
    %0 = vector.load %arg1[%c0, %c0_0] : memref<2x1024xf32, #tpu.memory_space<vmem>>, vector<2x1024xf32>
    %c0_1 = arith.constant 0 : index
    %c0_2 = arith.constant 0 : index
    %1 = vector.load %arg2[%c0_1, %c0_2] : memref<2x1024xf32, #tpu.memory_space<vmem>>, vector<2x1024xf32>
    %2 = arith.subf %0, %1 : vector<2x1024xf32>
    %3 = math.absf %2 : vector<2x1024xf32>
    %cst = arith.constant dense<0.000000e+00> : vector<2xf32>
    %4 = vector.multi_reduction <add>, %3, %cst [1] : vector<2x1024xf32> to vector<2xf32>
    %5 = vector.shape_cast %4 : vector<2xf32> to vector<2x1xf32>
    %c0_3 = arith.constant 0 : index
    %c0_4 = arith.constant 0 : index
    %6 = vector.load %arg3[%c0_3, %c0_4] : memref<2x1xf32, #tpu.memory_space<vmem>>, vector<2x1xf32>
    tpu.vector_store %arg3[%c0_3, %c0_4], %5 {strides = array<i32>} : memref<2x1xf32, #tpu.memory_space<vmem>>, vector<2x1xf32>,
    return
  }
  func.func @transform_0(%arg0: i32) -> (i32, i32) {
    %c0_i32 = arith.constant 0 : i32
    %c0_i32_0 = arith.constant 0 : i32
    return %arg0, %c0_i32 : i32, i32
  }
  func.func @transform_1(%arg0: i32) -> (i32, i32) {
    %c0_i32 = arith.constant 0 : i32
    %c0_i32_0 = arith.constant 0 : i32
    return %arg0, %c0_i32 : i32, i32
  }
  func.func @transform_2(%arg0: i32) -> (i32, i32) {
    %c0_i32 = arith.constant 0 : i32
    %c0_i32_0 = arith.constant 0 : i32
    return %arg0, %c0_i32 : i32, i32
  }
}

</mosaic_0001>

<bundles_post_ra>
// kernel: tpu_custom_call.1
= control target key start
LH: loop header
LB: loop body
LE: loop exit
PB: predicated region body
PF: predicated region fallthrough
CT: control target
= control target key end

     0   :  { %7 = vsyncpa [#allocation3], 0  ;;  %s182_s0 = inlined_call_operand.hbm [shape: f32[2,1024], index: 0, kind: input, shape index: {}]   ;;  %s183_s1 = inlined_call_operand.hbm [shape: f32[2,1024], index: 1, kind: input, shape index: {}]   ;;  %s184_s2 = inlined_call_operand.vmem [shape: f32[2,1], index: 2, kind: output, shape index: {}]  }
   0x1   :  { %s14_s11 = sshll.u32 %s182_s0, 4  ;;  %s15_s11 = int_to_ptr.hbm [resolvable:$true] %s14_s11 }
   0x2   :  { %8 = vsyncpa [#allocation5], 0  ;;  %s148_s12 = smov [#allocation2]   ;;  %s25_s16 = sshll.u32 %s183_s1, 4  ;;  %s26_s16 = int_to_ptr.hbm [resolvable:$true] %s25_s16 }
   0x3   :  { %s16_s13 = sshll.u32 %s148_s12, 4  ;;  %s149_s17 = smov [#allocation4]   ;;  %s17_s13 = int_to_ptr.vmem [resolvable:$true] %s16_s13 }
   0x4   :  { %19 = dma.hbm_to_vmem [thread:$0]  %s15_s11, 256, %s17_s13, [#allocation3]  }
   0x5   :  { %s27_s18 = sshll.u32 %s149_s17, 4  ;;  %s28_s18 = int_to_ptr.vmem [resolvable:$true] %s27_s18 }
   0x6   :  { %30 = dma.hbm_to_vmem [thread:$0]  %s26_s16, 256, %s28_s18, [#allocation5]  }
   0x7   :  { %144 = dma.done.wait [#allocation3], 256  }
   0x8   :  { %145 = vsyncadd [#allocation3], 4294967040 }
   0x9   :  { %146 = dma.done.wait [#allocation5], 256  }
   0xa   :  { %147 = vsyncadd [#allocation5], 4294967040  ;;  %v39_v0 = vld [vmem:[#allocation2] sm:$0xff]  ;;  %v40_v1 = vld [vmem:[#allocation2 + $0x8] sm:$0xff]  ;;  %vm68_vm0 = vcmask 1041408   ;;  %vm86_vm1 = vcmask 1024  }
   0xb   :  { %v41_v2 = vld [vmem:[#allocation4] sm:$0xff]  ;;  %v42_v3 = vld [vmem:[#allocation4 + $0x8] sm:$0xff] }
   0xc   :  { %v43_v4 = vsub.f32 %v39_v0, %v41_v2  ;;  %v44_v5 = vsub.f32 %v40_v1, %v42_v3 }
   0xe   :  { %v45_v6 = vand.u32 2147483647, %v43_v4  ;;  %v46_v7 = vand.u32 2147483647, %v44_v5 }
  0x10   :  { %49 = vst [vmem:[#allocation1] ss:$4 sm:$0xff] %v45_v6 }
  0x11   :  { %51 = vst [vmem:[#allocation1 + $0x20] ss:$4 sm:$0xff] %v46_v7 }
  0x17   :  { %v52_v8 = vld.sshfl [vmem:[#allocation1] sm:$0xff pattern:$0x73625140]  ;;  %v53_v9 = vld.sshfl [vmem:[#allocation1 + $0x8] sm:$0xff pattern:$0x73625140] }
  0x18   :  { %v54_v10 = vld.sshfl [vmem:[#allocation1 + $0x10] sm:$0xff pattern:$0x73625140]  ;;  %v55_v11 = vld.sshfl [vmem:[#allocation1 + $0x18] sm:$0xff pattern:$0x73625140] }
  0x19   :  { %v69_v12 = vsel %vm68_vm0, %v52_v8, 0.0  ;;  %v70_v13 = vsel %vm68_vm0, %v53_v9, 0.0  ;;  %v72_v14 = vsel %vm68_vm0, %v54_v10, 0.0  ;;  %v56_v15 = vld.sshfl [vmem:[#allocation1 + $0x20] sm:$0xff pattern:$0x73625140] }
  0x1a   :  { %v71_v16 = vadd.f32 %v70_v13, %v69_v12  ;;  %v74_v17 = vsel %vm68_vm0, %v55_v11, 0.0  ;;  %v57_v18 = vld.sshfl [vmem:[#allocation1 + $0x28] sm:$0xff pattern:$0x73625140]  ;;  %v76_v20 = vsel %vm68_vm0, %v56_v15, 0.0 }
  0x1b   :  { %v58_v21 = vld.sshfl [vmem:[#allocation1 + $0x30] sm:$0xff pattern:$0x73625140]  ;;  %v78_v23 = vsel %vm68_vm0, %v57_v18, 0.0 }
  0x1c   :  { %v73_v19 = vadd.f32 %v72_v14, %v71_v16  ;;  %v59_v24 = vld.sshfl [vmem:[#allocation1 + $0x38] sm:$0xff pattern:$0x73625140]  ;;  %v80_v26 = vsel %vm68_vm0, %v58_v21, 0.0 }
  0x1d   :  { %v82_v28 = vsel %vm68_vm0, %v59_v24, 0.0 }
  0x1e   :  { %v75_v22 = vadd.f32 %v74_v17, %v73_v19 }
  0x20   :  { %v77_v25 = vadd.f32 %v76_v20, %v75_v22 }
  0x22   :  { %v79_v27 = vadd.f32 %v78_v23, %v77_v25 }
  0x24   :  { %v81_v29 = vadd.f32 %v80_v26, %v79_v27 }
  0x26   :  { %v83_v30 = vadd.f32 %v82_v28, %v81_v29 }
  0x28   :  { %84 = vadd.xlane.f32.xlu0 %v83_v30 }
  0x9b   :  { %v85_v31 = vpop.xlane.xlu0 %84 }
  0x9c   :  { %87 = vst.msk [vmem:[%s184_s2] sm:$0x3] %vm86_vm1, %v85_v31 }
  0x9d   :  { %92 = vsyncpa [#allocation3], 1 }
  0x9e   :  { %93 = vsyncpa [#allocation5], 1 }

</bundles_post_ra>
